<compile_context>
chip_gen: v5e
topology: v5e:2x2
jax: 0.10.0
libtpu: 0.0.40
codegen_flags: <defaults>
</compile_context>

<pallas_src>
import functools

import jax
import jax.numpy as jnp
from jax.experimental import pallas as pl
from jax.experimental.pallas import tpu as pltpu


def _round_up(x, m):
    return ((x + m - 1) // m) * m


def _select_config():
    """Per-TPU-generation tile sizes and VMEM limit."""
    try:
        kind = jax.devices()[0].device_kind.lower()
    except Exception:
        kind = ""
    if "7" in kind:
        # v7x: 2 TensorCores/chip, only 64 MiB VMEM per TC, ~3.2 TB/s HBM.
        # tm=512 is already MXU-bound per TC; keep headroom below physical VMEM.
        return dict(tm=512, th=256, vmem_limit_bytes=48 * 1024 * 1024, num_cores=2)
    if "v6" in kind:
        # v6e: 918 TF/s bf16 vs ~1.36 TB/s HBM -> need tm >= ~675 to be
        # MXU-bound while streaming weights; 128 MiB physical VMEM.
        return dict(tm=768, th=512, vmem_limit_bytes=100 * 1024 * 1024, num_cores=1)
    if "v5" in kind:
        # v5e: crossover is tm ~= 240; tm=512 gives margin against DMA jitter.
        return dict(tm=512, th=512, vmem_limit_bytes=100 * 1024 * 1024, num_cores=1)
    # Unknown generation: conservative tiles / VMEM limit.
    return dict(tm=512, th=256, vmem_limit_bytes=48 * 1024 * 1024, num_cores=1)


def prepare_ffn_weights(w1, w2, w3, *, th, compute_dtype=jnp.bfloat16):
    """One-time (model-load) weight prep.

    Casts to the compute dtype, zero-pads H to a multiple of th (padded hidden
    units contribute exactly 0), and tile-interleaves W1|W2 into one (E, 2*Hp)
    matrix so that H-step h sees [W1_tile_h | W2_tile_h] as one contiguous
    2*th-wide block.

    Returns (w12, w3p, th) -- th may have been clamped for small H.
    """
    E, H = w1.shape
    assert w2.shape == (E, H) and w3.shape == (H, E)
    th = min(th, _round_up(H, 128))
    Hp = _round_up(H, th)
    w1c = w1.astype(compute_dtype)
    w2c = w2.astype(compute_dtype)
    w3c = w3.astype(compute_dtype)
    if Hp != H:
        pad = Hp - H
        w1c = jnp.pad(w1c, ((0, 0), (0, pad)))
        w2c = jnp.pad(w2c, ((0, 0), (0, pad)))
        w3c = jnp.pad(w3c, ((0, pad), (0, 0)))
    n = Hp // th
    w12 = jnp.stack(
        [w1c.reshape(E, n, th), w2c.reshape(E, n, th)], axis=2
    ).reshape(E, 2 * Hp)
    return w12, w3c, th


def _ffn_kernel(x_ref, w12_ref, w3_ref, o_ref, acc_ref, *, th, compute_dtype):
    # x_ref  : (tm, E)    input dtype; cast to compute dtype here (in VMEM)
    # w12_ref: (E, 2*th)  [W1 tile | W2 tile], compute dtype
    # w3_ref : (th, E)    compute dtype
    # o_ref  : (tm, E)    output dtype
    # acc_ref: (tm, E)    f32 accumulator, persists across the H axis
    h = pl.program_id(1)

    @pl.when(h == 0)
    def _():
        acc_ref[...] = jnp.zeros_like(acc_ref)

    x = x_ref[...].astype(compute_dtype)
    # One fused MXU pass: [h1 | h2] = x @ [W1_tile | W2_tile], f32 accumulate.
    h12 = jnp.dot(x, w12_ref[...], preferred_element_type=jnp.float32)
    h1 = h12[:, :th]
    h2 = h12[:, th:]
    # SiLU gate in f32 (exp -> EUP slot, muls -> VPU slot; hidden under MXU).
    gated = (h1 * jax.nn.sigmoid(h1)) * h2

    acc_ref[...] += jnp.dot(gated.astype(w3_ref.dtype), w3_ref[...],
                            preferred_element_type=jnp.float32)

    @pl.when(h == pl.num_programs(1) - 1)
    def _():
        o_ref[...] = acc_ref[...].astype(o_ref.dtype)


@functools.partial(
    jax.jit,
    static_argnames=("th", "tm", "compute_dtype", "vmem_limit_bytes", "num_cores"))
def feed_forward(x, w12, w3, *, th, tm, compute_dtype=jnp.bfloat16,
                 vmem_limit_bytes=100 * 1024 * 1024, num_cores=1):
    """SwiGLU FFN on prepared weights: (silu(x@W1) * (x@W2)) @ W3.

    x: [B, S, E]; w12: [E, 2*Hp], w3: [Hp, E] (from prepare_ffn_weights).
    Returns [B, S, E] in x.dtype.
    """
    B, S, E = x.shape
    Hp = w3.shape[0]
    T = B * S
    out_dtype = x.dtype

    # Clamp the row tile to the problem size (8-row alignment). On 2-core
    # chips (v7x) also shrink it so the "parallel" row axis has >= num_cores
    # programs; otherwise half the chip idles for small/decode T.
    tm = min(tm, _round_up(T, 8))
    if num_cores > 1:
        tm = min(tm, max(8, _round_up(pl.cdiv(T, num_cores), 8)))

    x2d = x.reshape(T, E)  # no cast here: the cast happens inside the kernel
    grid = (pl.cdiv(T, tm), Hp // th)

    w_item = jnp.dtype(compute_dtype).itemsize
    n_row = pl.cdiv(T, tm)
    cost = pl.CostEstimate(
        flops=6 * T * E * Hp,                    # three T x E x Hp matmuls
        transcendentals=T * Hp,                  # sigmoid
        bytes_accessed=(T * E * x.dtype.itemsize             # x (once / row tile)
                        + n_row * 3 * E * Hp * w_item        # weights re-streamed
                        + T * E * jnp.dtype(out_dtype).itemsize),
    )

    kernel = functools.partial(_ffn_kernel, th=th, compute_dtype=compute_dtype)

    out2d = pl.pallas_call(
        kernel,
        out_shape=jax.ShapeDtypeStruct((T, E), out_dtype),
        grid_spec=pltpu.PrefetchScalarGridSpec(
            num_scalar_prefetch=0,
            grid=grid,
            in_specs=[
                # x tile: resident across the H (reduction) axis.
                pl.BlockSpec((tm, E), lambda i, h: (i, 0)),
                # Fused [W1|W2] streamed over H (single weight DMA stream).
                pl.BlockSpec((E, 2 * th), lambda i, h: (0, h)),
                # W3 streamed over H.
                pl.BlockSpec((th, E), lambda i, h: (h, 0)),
            ],
            out_specs=pl.BlockSpec((tm, E), lambda i, h: (i, 0)),
            scratch_shapes=[pltpu.VMEM((tm, E), jnp.float32)],
        ),
        compiler_params=pltpu.CompilerParams(
            dimension_semantics=("parallel", "arbitrary"),
            vmem_limit_bytes=vmem_limit_bytes,
        ),
        cost_estimate=cost,
    )(x2d, w12, w3)

    return out2d.reshape(B, S, E)


if __name__ == "__main__":
    # Small config consistent with the module:
    #   cfg = {'emb_dim': 128, 'hidden_dim': 256, 'dtype': float32}
    B, S, E, H = 2, 8, 128, 256
    dtype = jnp.float32

    key = jax.random.PRNGKey(0)
    kx, k1, k2, k3 = jax.random.split(key, 4)

    x = jax.random.normal(kx, (B, S, E), dtype=dtype)
    # Weights stored transposed relative to torch.nn.Linear: W = linear.weight.T
    w1 = (jax.random.normal(k1, (E, H), dtype=dtype) * 0.02).astype(dtype)
    w2 = (jax.random.normal(k2, (E, H), dtype=dtype) * 0.02).astype(dtype)
    w3 = (jax.random.normal(k3, (H, E), dtype=dtype) * 0.02).astype(dtype)

    hw = _select_config()

    # 1) f32 compute path vs. pure-f32 reference (tight tolerance).
    w12_f32, w3p_f32, th_f32 = prepare_ffn_weights(
        w1, w2, w3, th=hw["th"], compute_dtype=jnp.float32)
    y_f32 = jax.block_until_ready(feed_forward(
        x, w12_f32, w3p_f32, th=th_f32, tm=hw["tm"],
        compute_dtype=jnp.float32, vmem_limit_bytes=hw["vmem_limit_bytes"],
        num_cores=hw["num_cores"]))
    h1 = x @ w1
    h2 = x @ w2
    y_ref_f32 = (h1 * jax.nn.sigmoid(h1) * h2) @ w3
    assert jnp.allclose(y_f32, y_ref_f32, atol=1e-4, rtol=1e-4), \
        "f32 kernel mismatch vs reference"

    # 2) Default bf16-operand / f32-accumulate path vs. matched reference.
    #    (bf16 MXU operands lose a little precision vs a pure-f32 module; the
    #     reference below mirrors the kernel's casting exactly.)
    w12_bf, w3p_bf, th_bf = prepare_ffn_weights(
        w1, w2, w3, th=hw["th"], compute_dtype=jnp.bfloat16)
    y_bf16 = jax.block_until_ready(feed_forward(
        x, w12_bf, w3p_bf, th=th_bf, tm=hw["tm"],
        compute_dtype=jnp.bfloat16, vmem_limit_bytes=hw["vmem_limit_bytes"],
        num_cores=hw["num_cores"]))
    xc = x.astype(jnp.bfloat16)
    h1c = jnp.dot(xc, w1.astype(jnp.bfloat16), preferred_element_type=jnp.float32)
    h2c = jnp.dot(xc, w2.astype(jnp.bfloat16), preferred_element_type=jnp.float32)
    gc = (h1c * jax.nn.sigmoid(h1c)) * h2c
    y_ref_bf16 = jnp.dot(gc.astype(jnp.bfloat16), w3.astype(jnp.bfloat16),
                         preferred_element_type=jnp.float32).astype(dtype)
    assert jnp.allclose(y_bf16, y_ref_bf16, atol=5e-3, rtol=5e-2), \
        "bf16 kernel mismatch vs matched reference"

    print("KERNEL_OK")
</pallas_src>

<mosaic_0001>
module attributes {stable_mosaic.version = 11 : i64} {
  func.func @_ffn_kernel(%arg0: i32, %arg1: i32, %arg2: memref<16x128xf32, #tpu.memory_space<vmem>>, %arg3: memref<128x512xf32, #tpu.memory_space<vmem>>, %arg4: memref<256x128xf32, #tpu.memory_space<vmem>>, %arg5: memref<16x128xf32, #tpu.memory_space<vmem>>, %arg6: memref<16x128xf32, #tpu.memory_space<vmem>>) attributes {dimension_semantics = [#tpu.dimension_semantics<parallel>, #tpu.dimension_semantics<arbitrary>], iteration_bounds = array<i64: 1, 1>, scalar_prefetch = 0 : i64, scratch_operands = 1 : i64, tpu.core_type = #tpu.core_type<tc>, window_params = [{transform_indices = @transform_0, window_bounds = array<i64: 16, 128>}, {transform_indices = @transform_1, window_bounds = array<i64: 128, 512>}, {transform_indices = @transform_2, window_bounds = array<i64: 256, 128>}, {transform_indices = @transform_3, window_bounds = array<i64: 16, 128>}]} {
    %c0_i32 = arith.constant 0 : i32
    %0 = arith.cmpi eq, %arg1, %c0_i32 : i32
    %1 = arith.extui %0 : i1 to i32
    %c0_i32_0 = arith.constant 0 : i32
    %2 = arith.cmpi ne, %1, %c0_i32_0 : i32
    scf.if %2 {
      %cst_14 = arith.constant 0.000000e+00 : f32
      %23 = vector.broadcast %cst_14 : f32 to vector<16x128xf32>
      %c0_15 = arith.constant 0 : index
      %c0_16 = arith.constant 0 : index
      %24 = vector.load %arg6[%c0_15, %c0_16] : memref<16x128xf32, #tpu.memory_space<vmem>>, vector<16x128xf32>
      tpu.vector_store %arg6[%c0_15, %c0_16], %23 {strides = array<i32>} : memref<16x128xf32, #tpu.memory_space<vmem>>, vector<16x128xf32>,
    } else {
    }
    %c0 = arith.constant 0 : index
    %c0_1 = arith.constant 0 : index
    %3 = vector.load %arg2[%c0, %c0_1] : memref<16x128xf32, #tpu.memory_space<vmem>>, vector<16x128xf32>
    %c0_2 = arith.constant 0 : index
    %c0_3 = arith.constant 0 : index
    %4 = vector.load %arg3[%c0_2, %c0_3] : memref<128x512xf32, #tpu.memory_space<vmem>>, vector<128x512xf32>
    %cst = arith.constant dense<0.000000e+00> : vector<16x512xf32>
    %5 = tpu.matmul %3, %4, %cst {dimension_numbers = #tpu.dot_dimension_numbers<[1], [0], [0], [1], [0, 0, 1, 1], [], []>} : vector<16x128xf32>, vector<128x512xf32>, vector<16x512xf32> -> vector<16x512xf32>
    %6 = vector.extract_strided_slice %5 {offsets = [0, 0], sizes = [16, 256], strides = [1, 1]} : vector<16x512xf32> to vector<16x256xf32>
    %7 = vector.extract_strided_slice %5 {offsets = [0, 256], sizes = [16, 256], strides = [1, 1]} : vector<16x512xf32> to vector<16x256xf32>
    %8 = arith.negf %6 : vector<16x256xf32>
    %9 = math.exp %8 : vector<16x256xf32>
    %cst_4 = arith.constant 1.000000e+00 : f32
    %10 = vector.broadcast %cst_4 : f32 to vector<16x256xf32>
    %11 = arith.addf %10, %9 : vector<16x256xf32>
    %12 = arith.divf %10, %11 : vector<16x256xf32>
    %13 = arith.mulf %6, %12 : vector<16x256xf32>
    %14 = arith.mulf %13, %7 : vector<16x256xf32>
    %c0_5 = arith.constant 0 : index
    %c0_6 = arith.constant 0 : index
    %15 = vector.load %arg6[%c0_5, %c0_6] : memref<16x128xf32, #tpu.memory_space<vmem>>, vector<16x128xf32>
    %c0_7 = arith.constant 0 : index
    %c0_8 = arith.constant 0 : index
    %16 = vector.load %arg4[%c0_7, %c0_8] : memref<256x128xf32, #tpu.memory_space<vmem>>, vector<256x128xf32>
    %cst_9 = arith.constant dense<0.000000e+00> : vector<16x128xf32>
    %17 = tpu.matmul %14, %16, %cst_9 {dimension_numbers = #tpu.dot_dimension_numbers<[1], [0], [0], [1], [0, 0, 1, 1], [], []>} : vector<16x256xf32>, vector<256x128xf32>, vector<16x128xf32> -> vector<16x128xf32>
    %18 = arith.addf %15, %17 : vector<16x128xf32>
    %c0_10 = arith.constant 0 : index
    %c0_11 = arith.constant 0 : index
    %19 = vector.load %arg6[%c0_10, %c0_11] : memref<16x128xf32, #tpu.memory_space<vmem>>, vector<16x128xf32>
    tpu.vector_store %arg6[%c0_10, %c0_11], %18 {strides = array<i32>} : memref<16x128xf32, #tpu.memory_space<vmem>>, vector<16x128xf32>,
    %c0_i32_12 = arith.constant 0 : i32
    %20 = arith.cmpi eq, %arg1, %c0_i32_12 : i32
    %21 = arith.extui %20 : i1 to i32
    %c0_i32_13 = arith.constant 0 : i32
    %22 = arith.cmpi ne, %21, %c0_i32_13 : i32
    scf.if %22 {
      %c0_14 = arith.constant 0 : index
      %c0_15 = arith.constant 0 : index
      %23 = vector.load %arg6[%c0_14, %c0_15] : memref<16x128xf32, #tpu.memory_space<vmem>>, vector<16x128xf32>
      %c0_16 = arith.constant 0 : index
      %c0_17 = arith.constant 0 : index
      %24 = vector.load %arg5[%c0_16, %c0_17] : memref<16x128xf32, #tpu.memory_space<vmem>>, vector<16x128xf32>
      tpu.vector_store %arg5[%c0_16, %c0_17], %23 {strides = array<i32>} : memref<16x128xf32, #tpu.memory_space<vmem>>, vector<16x128xf32>,
    } else {
    }
    return
  }
  func.func @transform_0(%arg0: i32, %arg1: i32) -> (i32, i32) {
    %c0_i32 = arith.constant 0 : i32
    %c0_i32_0 = arith.constant 0 : i32
    return %arg0, %c0_i32 : i32, i32
  }
  func.func @transform_1(%arg0: i32, %arg1: i32) -> (i32, i32) {
    %c0_i32 = arith.constant 0 : i32
    %c0_i32_0 = arith.constant 0 : i32
    return %c0_i32, %arg1 : i32, i32
  }
  func.func @transform_2(%arg0: i32, %arg1: i32) -> (i32, i32) {
    %c0_i32 = arith.constant 0 : i32
    %c0_i32_0 = arith.constant 0 : i32
    return %arg1, %c0_i32 : i32, i32
  }
  func.func @transform_3(%arg0: i32, %arg1: i32) -> (i32, i32) {
    %c0_i32 = arith.constant 0 : i32
    %c0_i32_0 = arith.constant 0 : i32
    return %arg0, %c0_i32 : i32, i32
  }
}

</mosaic_0001>

<bundles_post_ra>
// kernel: feed_forward.1
= control target key start
LH: loop header
LB: loop body
LE: loop exit
PB: predicated region body
PF: predicated region fallthrough
CT: control target
= control target key end

     0   :  { %8 = vsyncpa [#allocation4], 0  ;;  %s648_s0 = inlined_call_operand.hbm [shape: f32[16,128], index: 0, kind: input, shape index: {}]   ;;  %s649_s1 = inlined_call_operand.hbm [shape: f32[128,512], index: 1, kind: input, shape index: {}]   ;;  %s650_s2 = inlined_call_operand.hbm [shape: f32[256,128], index: 2, kind: input, shape index: {}]   ;;  %s651_s3 = inlined_call_operand.hbm [shape: f32[16,128], index: 3, kind: output, shape index: {}]  }
   0x1   :  { %9 = vsyncpa [#allocation7], 0  ;;  %s28_s14 = sshll.u32 %s649_s1, 4  ;;  %s29_s14 = int_to_ptr.hbm [resolvable:$true] %s28_s14 }
   0x2   :  { %10 = vsyncpa [#allocation5], 0  ;;  %s583_s15 = smov [#allocation6]   ;;  %s15_s19 = sshll.u32 %s648_s0, 4  ;;  %s16_s19 = int_to_ptr.hbm [resolvable:$true] %s15_s19 }
   0x3   :  { %s30_s16 = sshll.u32 %s583_s15, 4  ;;  %s584_s20 = smov 512   ;;  %s31_s16 = int_to_ptr.vmem [resolvable:$true] %s30_s16 }
   0x4   :  { %s585_s21 = smov 32   ;;  %s586_s22 = smov [#allocation3]  }
   0x5   :  { %36 = dma.hbm_to_vmem [thread:$0]  %s29_s14, 8192, %s31_s16, [#allocation7], %s584_s20, %s584_s20, %s585_s21  }
   0x6   :  { %s17_s23 = sshll.u32 %s586_s22, 4  ;;  %s587_s24 = smov 128   ;;  %s18_s23 = int_to_ptr.vmem [resolvable:$true] %s17_s23 }
   0x7   :  { %s588_s25 = smov 8   ;;  %s41_s27 = sshll.u32 %s650_s2, 4  ;;  %s42_s27 = int_to_ptr.hbm [resolvable:$true] %s41_s27 }
   0x8   :  { %23 = dma.hbm_to_vmem [thread:$0]  %s16_s19, 256, %s18_s23, [#allocation4], %s587_s24, %s587_s24, %s588_s25  }
   0x9   :  { %s589_s28 = smov [#allocation8]  }
   0xa   :  { %s43_s0 = sshll.u32 %s589_s28, 4  ;;  %s44_s0 = int_to_ptr.vmem [resolvable:$true] %s43_s0 }
   0xb   :  { %49 = dma.hbm_to_vmem [thread:$0]  %s42_s27, 4096, %s44_s0, [#allocation7], %s587_s24, %s587_s24, %s588_s25  }
   0xc   :  { %577 = dma.done.wait [#allocation4], 256  }
   0xd   :  { %578 = vsyncadd [#allocation4], 4294967040 }
   0xe   :  { %579 = dma.done.wait [#allocation7], 12288  }
   0xf   :  { %580 = vsyncadd [#allocation7], 4294955008  ;;  %v130_v0 = vld [vmem:[#allocation6 + $0x1e0] sm:$0xff]  ;;  %v131_v1 = vld [vmem:[#allocation6 + $0x1e8] sm:$0xff]  ;;  %s590_s2 = smov [#allocation9]   ;;  %s407_s5 = sshll.u32 %s651_s3, 4  ;;  %s408_s5 = int_to_ptr.hbm [resolvable:$true] %s407_s5 }
  0x10   :  { %v126_v2 = vld [vmem:[#allocation6 + $0x1c0] sm:$0xff]  ;;  %134 = vmatpush.msra.mxu0 %v130_v0  ;;  %157 = vmatpush.msra.mxu1 %v131_v1  ;;  %v127_v3 = vld [vmem:[#allocation6 + $0x1c8] sm:$0xff]  ;;  %v132_v12 = vld [vmem:[#allocation6 + $0x1f0] sm:$0xff]  ;;  %s405_s29 = sshll.u32 %s590_s2, 4  ;;  %s406_s29 = int_to_ptr.vmem [resolvable:$true] %s405_s29 }
  0x11   :  { %v122_v4 = vld [vmem:[#allocation6 + $0x1a0] sm:$0xff]  ;;  %v123_v5 = vld [vmem:[#allocation6 + $0x1a8] sm:$0xff]  ;;  %v133_v14 = vld [vmem:[#allocation6 + $0x1f8] sm:$0xff]  ;;  %180 = vmatpush.msra.mxu2 %v132_v12 }
  0x12   :  { %135 = vmatpush.msra.mxu0 %v126_v2  ;;  %158 = vmatpush.msra.mxu1 %v127_v3  ;;  %v118_v6 = vld [vmem:[#allocation6 + $0x180] sm:$0xff]  ;;  %v119_v7 = vld [vmem:[#allocation6 + $0x188] sm:$0xff]  ;;  %v128_v16 = vld [vmem:[#allocation6 + $0x1d0] sm:$0xff] }
  0x13   :  { %v114_v8 = vld [vmem:[#allocation6 + $0x160] sm:$0xff]  ;;  %v115_v9 = vld [vmem:[#allocation6 + $0x168] sm:$0xff]  ;;  %203 = vmatpush.msra.mxu3 %v133_v14  ;;  %v129_v17 = vld [vmem:[#allocation6 + $0x1d8] sm:$0xff]  ;;  %181 = vmatpush.msra.mxu2 %v128_v16 }
  0x14   :  { %136 = vmatpush.msra.mxu0 %v122_v4  ;;  %159 = vmatpush.msra.mxu1 %v123_v5  ;;  %v110_v10 = vld [vmem:[#allocation6 + $0x140] sm:$0xff]  ;;  %v111_v11 = vld [vmem:[#allocation6 + $0x148] sm:$0xff]  ;;  %v124_v18 = vld [vmem:[#allocation6 + $0x1b0] sm:$0xff] }
  0x15   :  { %v106_v13 = vld [vmem:[#allocation6 + $0x120] sm:$0xff]  ;;  %v107_v15 = vld [vmem:[#allocation6 + $0x128] sm:$0xff]  ;;  %v125_v19 = vld [vmem:[#allocation6 + $0x1b8] sm:$0xff]  ;;  %204 = vmatpush.msra.mxu3 %v129_v17  ;;  %182 = vmatpush.msra.mxu2 %v124_v18 }
  0x16   :  { %137 = vmatpush.msra.mxu0 %v118_v6  ;;  %160 = vmatpush.msra.mxu1 %v119_v7  ;;  %v102_v20 = vld [vmem:[#allocation6 + $0x100] sm:$0xff]  ;;  %v103_v21 = vld [vmem:[#allocation6 + $0x108] sm:$0xff]  ;;  %v120_v22 = vld [vmem:[#allocation6 + $0x190] sm:$0xff] }
  0x17   :  { %v121_v23 = vld [vmem:[#allocation6 + $0x198] sm:$0xff]  ;;  %v98_v24 = vld [vmem:[#allocation6 + $0xe0] sm:$0xff]  ;;  %v99_v25 = vld [vmem:[#allocation6 + $0xe8] sm:$0xff]  ;;  %205 = vmatpush.msra.mxu3 %v125_v19  ;;  %183 = vmatpush.msra.mxu2 %v120_v22 }
  0x18   :  { %138 = vmatpush.msra.mxu0 %v114_v8  ;;  %161 = vmatpush.msra.mxu1 %v115_v9  ;;  %v116_v26 = vld [vmem:[#allocation6 + $0x170] sm:$0xff]  ;;  %v117_v27 = vld [vmem:[#allocation6 + $0x178] sm:$0xff]  ;;  %v94_v28 = vld [vmem:[#allocation6 + $0xc0] sm:$0xff] }
  0x19   :  { %v95_v29 = vld [vmem:[#allocation6 + $0xc8] sm:$0xff]  ;;  %206 = vmatpush.msra.mxu3 %v121_v23  ;;  %v112_v30 = vld [vmem:[#allocation6 + $0x150] sm:$0xff]  ;;  %v113_v31 = vld [vmem:[#allocation6 + $0x158] sm:$0xff]  ;;  %184 = vmatpush.msra.mxu2 %v116_v26 }
  0x1a   :  { %139 = vmatpush.msra.mxu0 %v110_v10  ;;  %162 = vmatpush.msra.mxu1 %v111_v11  ;;  %v90_v32 = vld [vmem:[#allocation6 + $0xa0] sm:$0xff]  ;;  %v91_v33 = vld [vmem:[#allocation6 + $0xa8] sm:$0xff]  ;;  %v108_v34 = vld [vmem:[#allocation6 + $0x130] sm:$0xff] }
  0x1b   :  { %207 = vmatpush.msra.mxu3 %v117_v27  ;;  %v109_v35 = vld [vmem:[#allocation6 + $0x138] sm:$0xff]  ;;  %v86_v36 = vld [vmem:[#allocation6 + $0x80] sm:$0xff]  ;;  %v87_v37 = vld [vmem:[#allocation6 + $0x88] sm:$0xff]  ;;  %185 = vmatpush.msra.mxu2 %v112_v30 }
  0x1c   :  { %140 = vmatpush.msra.mxu0 %v106_v13  ;;  %163 = vmatpush.msra.mxu1 %v107_v15  ;;  %v104_v38 = vld [vmem:[#allocation6 + $0x110] sm:$0xff]  ;;  %v105_v39 = vld [vmem:[#allocation6 + $0x118] sm:$0xff]  ;;  %v82_v40 = vld [vmem:[#allocation6 + $0x60] sm:$0xff] }
  0x1d   :  { %208 = vmatpush.msra.mxu3 %v113_v31  ;;  %v83_v41 = vld [vmem:[#allocation6 + $0x68] sm:$0xff]  ;;  %186 = vmatpush.msra.mxu2 %v108_v34  ;;  %v100_v42 = vld [vmem:[#allocation6 + $0xf0] sm:$0xff]  ;;  %v101_v43 = vld [vmem:[#allocation6 + $0xf8] sm:$0xff] }
  0x1e   :  { %141 = vmatpush.msra.mxu0 %v102_v20  ;;  %164 = vmatpush.msra.mxu1 %v103_v21  ;;  %v78_v44 = vld [vmem:[#allocation6 + $0x40] sm:$0xff]  ;;  %v79_v45 = vld [vmem:[#allocation6 + $0x48] sm:$0xff]  ;;  %v96_v46 = vld [vmem:[#allocation6 + $0xd0] sm:$0xff] }
  0x1f   :  { %209 = vmatpush.msra.mxu3 %v109_v35  ;;  %187 = vmatpush.msra.mxu2 %v104_v38  ;;  %v97_v47 = vld [vmem:[#allocation6 + $0xd8] sm:$0xff]  ;;  %v74_v48 = vld [vmem:[#allocation6 + $0x20] sm:$0xff]  ;;  %v75_v49 = vld [vmem:[#allocation6 + $0x28] sm:$0xff] }
  0x20   :  { %142 = vmatpush.msra.mxu0 %v98_v24  ;;  %165 = vmatpush.msra.mxu1 %v99_v25  ;;  %v92_v50 = vld [vmem:[#allocation6 + $0xb0] sm:$0xff]  ;;  %v93_v51 = vld [vmem:[#allocation6 + $0xb8] sm:$0xff]  ;;  %v70_v52 = vld [vmem:[#allocation6] sm:$0xff] }
  0x21   :  { %210 = vmatpush.msra.mxu3 %v105_v39  ;;  %188 = vmatpush.msra.mxu2 %v100_v42  ;;  %v71_v53 = vld [vmem:[#allocation6 + $0x8] sm:$0xff]  ;;  %v68_v54 = vld [vmem:[#allocation3] sm:$0xff]  ;;  %v89_v56 = vld [vmem:[#allocation6 + $0x98] sm:$0xff] }
  0x22   :  { %143 = vmatpush.msra.mxu0 %v94_v28  ;;  %166 = vmatpush.msra.mxu1 %v95_v29  ;;  %v88_v55 = vld [vmem:[#allocation6 + $0x90] sm:$0xff]  ;;  %v85_v58 = vld [vmem:[#allocation6 + $0x78] sm:$0xff]  ;;  %v325_v6 = vld [vmem:[#allocation8 + $0x68] sm:$0xff] }
  0x23   :  { %211 = vmatpush.msra.mxu3 %v101_v43  ;;  %189 = vmatpush.msra.mxu2 %v96_v46  ;;  %v84_v57 = vld [vmem:[#allocation6 + $0x70] sm:$0xff]  ;;  %v81_v60 = vld [vmem:[#allocation6 + $0x58] sm:$0xff]  ;;  %v341_v7 = vld [vmem:[#allocation8 + $0xe8] sm:$0xff] }
  0x24   :  { %144 = vmatpush.msra.mxu0 %v90_v32  ;;  %167 = vmatpush.msra.mxu1 %v91_v33  ;;  %v80_v59 = vld [vmem:[#allocation6 + $0x50] sm:$0xff]  ;;  %v77_v62 = vld [vmem:[#allocation6 + $0x38] sm:$0xff]  ;;  %v324_v8 = vld [vmem:[#allocation8 + $0x60] sm:$0xff] }
  0x25   :  { %212 = vmatpush.msra.mxu3 %v97_v47  ;;  %190 = vmatpush.msra.mxu2 %v92_v50  ;;  %v76_v61 = vld [vmem:[#allocation6 + $0x30] sm:$0xff]  ;;  %v69_v63 = vld [vmem:[#allocation3 + $0x8] sm:$0xff]  ;;  %v340_v9 = vld [vmem:[#allocation8 + $0xe0] sm:$0xff] }
  0x26   :  { %145 = vmatpush.msra.mxu0 %v86_v36  ;;  %168 = vmatpush.msra.mxu1 %v87_v37  ;;  %v72_v0 = vld [vmem:[#allocation6 + $0x10] sm:$0xff]  ;;  %v73_v1 = vld [vmem:[#allocation6 + $0x18] sm:$0xff]  ;;  %v321_v14 = vld [vmem:[#allocation8 + $0x48] sm:$0xff] }
  0x27   :  { %213 = vmatpush.msra.mxu3 %v93_v51  ;;  %191 = vmatpush.msra.mxu2 %v88_v55  ;;  %v327_v2 = vld [vmem:[#allocation8 + $0x78] sm:$0xff]  ;;  %v326_v4 = vld [vmem:[#allocation8 + $0x70] sm:$0xff]  ;;  %v337_v15 = vld [vmem:[#allocation8 + $0xc8] sm:$0xff] }
  0x28   :  { %146 = vmatpush.msra.mxu0 %v82_v40  ;;  %169 = vmatpush.msra.mxu1 %v83_v41  ;;  %v343_v3 = vld [vmem:[#allocation8 + $0xf8] sm:$0xff]  ;;  %v342_v5 = vld [vmem:[#allocation8 + $0xf0] sm:$0xff]  ;;  %v320_v16 = vld [vmem:[#allocation8 + $0x40] sm:$0xff] }
  0x29   :  { %214 = vmatpush.msra.mxu3 %v89_v56  ;;  %192 = vmatpush.msra.mxu2 %v84_v57  ;;  %v323_v10 = vld [vmem:[#allocation8 + $0x58] sm:$0xff]  ;;  %v322_v12 = vld [vmem:[#allocation8 + $0x50] sm:$0xff]  ;;  %v336_v17 = vld [vmem:[#allocation8 + $0xc0] sm:$0xff] }
  0x2a   :  { %147 = vmatpush.msra.mxu0 %v78_v44  ;;  %170 = vmatpush.msra.mxu1 %v79_v45  ;;  %v339_v11 = vld [vmem:[#allocation8 + $0xd8] sm:$0xff]  ;;  %v338_v13 = vld [vmem:[#allocation8 + $0xd0] sm:$0xff]  ;;  %v317_v22 = vld [vmem:[#allocation8 + $0x28] sm:$0xff] }
  0x2b   :  { %215 = vmatpush.msra.mxu3 %v85_v58  ;;  %193 = vmatpush.msra.mxu2 %v80_v59  ;;  %v319_v18 = vld [vmem:[#allocation8 + $0x38] sm:$0xff]  ;;  %v318_v20 = vld [vmem:[#allocation8 + $0x30] sm:$0xff]  ;;  %v333_v23 = vld [vmem:[#allocation8 + $0xa8] sm:$0xff] }
  0x2c   :  { %148 = vmatpush.msra.mxu0 %v74_v48  ;;  %171 = vmatpush.msra.mxu1 %v75_v49  ;;  %v335_v19 = vld [vmem:[#allocation8 + $0xb8] sm:$0xff]  ;;  %v334_v21 = vld [vmem:[#allocation8 + $0xb0] sm:$0xff]  ;;  %v316_v24 = vld [vmem:[#allocation8 + $0x20] sm:$0xff] }
  0x2d   :  { %216 = vmatpush.msra.mxu3 %v81_v60  ;;  %194 = vmatpush.msra.mxu2 %v76_v61  ;;  %v332_v25 = vld [vmem:[#allocation8 + $0xa0] sm:$0xff]  ;;  %v315_v26 = vld [vmem:[#allocation8 + $0x18] sm:$0xff]  ;;  %v314_v28 = vld [vmem:[#allocation8 + $0x10] sm:$0xff] }
  0x2e   :  { %149 = vmatpush.msra.mxu0 %v70_v52  ;;  %172 = vmatpush.msra.mxu1 %v71_v53  ;;  %v331_v27 = vld [vmem:[#allocation8 + $0x98] sm:$0xff]  ;;  %v330_v29 = vld [vmem:[#allocation8 + $0x90] sm:$0xff]  ;;  %v313_v34 = vld [vmem:[#allocation8 + $0x8] sm:$0xff] }
  0x2f   :  { %150 = vmatmul.f32.vlgmr.msra.gmra.mxu0 %v68_v54  ;;  %173 = vmatmul.f32.vlgmr.msra.gmra.mxu1 %v68_v54  ;;  %v329_v35 = vld [vmem:[#allocation8 + $0x88] sm:$0xff]  ;;  %v312_v36 = vld [vmem:[#allocation8] sm:$0xff] }
  0x30   :  { %217 = vmatpush.msra.mxu3 %v77_v62  ;;  %195 = vmatpush.msra.mxu2 %v72_v0  ;;  %v328_v37 = vld [vmem:[#allocation8 + $0x80] sm:$0xff] }
  0x31   :  { %196 = vmatmul.f32.vlgmr.msra.gmra.mxu2 %v68_v54  ;;  %344 = vmatpush.msrb.mxu0 %v327_v2 }
  0x32   :  { %218 = vmatpush.msra.mxu3 %v73_v1  ;;  %367 = vmatpush.msrb.mxu1 %v343_v3 }
  0x33   :  { %219 = vmatmul.f32.vlgmr.msra.gmra.mxu3 %v68_v54  ;;  %425 = vmatpush.msrb.mxu2 %v327_v2 }
  0x34   :  { %441 = vmatpush.msrb.mxu3 %v343_v3  ;;  %345 = vmatpush.msrb.mxu0 %v326_v4 }
  0x35   :  { %368 = vmatpush.msrb.mxu1 %v342_v5  ;;  %426 = vmatpush.msrb.mxu2 %v326_v4 }
  0x36   :  { %442 = vmatpush.msrb.mxu3 %v342_v5  ;;  %346 = vmatpush.msrb.mxu0 %v325_v6 }
  0x37   :  { %153 = vmatmul.f32.gmra.mxu0 %v69_v63  ;;  %176 = vmatmul.f32.gmra.mxu1 %v69_v63 }
  0x38   :  { %369 = vmatpush.msrb.mxu1 %v341_v7  ;;  %427 = vmatpush.msrb.mxu2 %v325_v6 }
  0x39   :  { %199 = vmatmul.f32.gmra.mxu2 %v69_v63  ;;  %443 = vmatpush.msrb.mxu3 %v341_v7 }
  0x3a   :  { %347 = vmatpush.msrb.mxu0 %v324_v8  ;;  %370 = vmatpush.msrb.mxu1 %v340_v9 }
  0x3b   :  { %222 = vmatmul.f32.gmra.mxu3 %v69_v63  ;;  %428 = vmatpush.msrb.mxu2 %v324_v8 }
  0x3c   :  { %444 = vmatpush.msrb.mxu3 %v340_v9  ;;  %348 = vmatpush.msrb.mxu0 %v323_v10 }
  0x3d   :  { %371 = vmatpush.msrb.mxu1 %v339_v11  ;;  %429 = vmatpush.msrb.mxu2 %v323_v10 }
  0x3e   :  { %445 = vmatpush.msrb.mxu3 %v339_v11  ;;  %349 = vmatpush.msrb.mxu0 %v322_v12 }
  0x3f   :  { %372 = vmatpush.msrb.mxu1 %v338_v13  ;;  %430 = vmatpush.msrb.mxu2 %v322_v12 }
  0x40   :  { %446 = vmatpush.msrb.mxu3 %v338_v13  ;;  %350 = vmatpush.msrb.mxu0 %v321_v14 }
  0x41   :  { %373 = vmatpush.msrb.mxu1 %v337_v15  ;;  %431 = vmatpush.msrb.mxu2 %v321_v14 }
  0x42   :  { %447 = vmatpush.msrb.mxu3 %v337_v15  ;;  %351 = vmatpush.msrb.mxu0 %v320_v16 }
  0x43   :  { %374 = vmatpush.msrb.mxu1 %v336_v17  ;;  %432 = vmatpush.msrb.mxu2 %v320_v16 }
  0x44   :  { %448 = vmatpush.msrb.mxu3 %v336_v17  ;;  %352 = vmatpush.msrb.mxu0 %v319_v18 }
  0x45   :  { %375 = vmatpush.msrb.mxu1 %v335_v19  ;;  %433 = vmatpush.msrb.mxu2 %v319_v18 }
  0x46   :  { %449 = vmatpush.msrb.mxu3 %v335_v19  ;;  %353 = vmatpush.msrb.mxu0 %v318_v20 }
  0x47   :  { %376 = vmatpush.msrb.mxu1 %v334_v21  ;;  %434 = vmatpush.msrb.mxu2 %v318_v20 }
  0x48   :  { %450 = vmatpush.msrb.mxu3 %v334_v21  ;;  %354 = vmatpush.msrb.mxu0 %v317_v22 }
  0x49   :  { %377 = vmatpush.msrb.mxu1 %v333_v23  ;;  %435 = vmatpush.msrb.mxu2 %v317_v22 }
  0x4a   :  { %451 = vmatpush.msrb.mxu3 %v333_v23  ;;  %355 = vmatpush.msrb.mxu0 %v316_v24 }
  0x4b   :  { %378 = vmatpush.msrb.mxu1 %v332_v25  ;;  %436 = vmatpush.msrb.mxu2 %v316_v24 }
  0x4c   :  { %452 = vmatpush.msrb.mxu3 %v332_v25  ;;  %356 = vmatpush.msrb.mxu0 %v315_v26 }
  0x4d   :  { %379 = vmatpush.msrb.mxu1 %v331_v27  ;;  %437 = vmatpush.msrb.mxu2 %v315_v26 }
  0x4e   :  { %453 = vmatpush.msrb.mxu3 %v331_v27  ;;  %357 = vmatpush.msrb.mxu0 %v314_v28 }
  0x4f   :  { %380 = vmatpush.msrb.mxu1 %v330_v29  ;;  %438 = vmatpush.msrb.mxu2 %v314_v28 }
  0x50   :  { %454 = vmatpush.msrb.mxu3 %v330_v29  ;;  %358 = vmatpush.msrb.mxu0 %v313_v34 }
  0x51   :  { %381 = vmatpush.msrb.mxu1 %v329_v35  ;;  %439 = vmatpush.msrb.mxu2 %v313_v34 }
  0x52   :  { %455 = vmatpush.msrb.mxu3 %v329_v35  ;;  %359 = vmatpush.msrb.mxu0 %v312_v36 }
  0x53   :  { %382 = vmatpush.msrb.mxu1 %v328_v37  ;;  %440 = vmatpush.msrb.mxu2 %v312_v36 }
  0x54   :  { %456 = vmatpush.msrb.mxu3 %v328_v37 }
  0xac   :  { %v626_v30 = vpop.f32.mrf.mxu0  ;;  %v628_v31 = vpop.f32.mrf.mxu1 }
  0xad   :  { %v421_v32 = vmul.f32 -1.442695, %v626_v30  ;;  %v422_v33 = vmul.f32 -1.442695, %v628_v31 }
  0xaf   :  { %465 = vpow2.f32 %v421_v32 }
  0xb0   :  { %467 = vpow2.f32 %v422_v33 }
  0xb4   :  { %v632_v38 = vpop.f32.mrf.mxu0  ;;  %v634_v39 = vpop.f32.mrf.mxu1 }
  0xb5   :  { %v466_v40 = vpop.eup %465  ;;  %v423_v41 = vmul.f32 -1.442695, %v632_v38  ;;  %v424_v44 = vmul.f32 -1.442695, %v634_v39  ;;  %v197_v2 = vpop.f32.mrf.mxu2 }
  0xb6   :  { %v468_v42 = vpop.eup %467  ;;  %v238_v43 = vadd.f32 1.0, %v466_v40  ;;  %v220_v12 = vpop.f32.mrf.mxu3 }
  0xb7   :  { %v239_v45 = vadd.f32 1.0, %v468_v42  ;;  %469 = vpow2.f32 %v423_v41 }
  0xb8   :  { %471 = vrcp.f32 %v238_v43  ;;  %v251_v55 = vand.u32 2147483647, %v238_v43  ;;  %v253_v56 = vand.u32 2147483648, %v238_v43  ;;  %vm247_vm2 = vweird.f32 %v238_v43 }
  0xb9   :  { %473 = vrcp.f32 %v239_v45  ;;  %v268_v59 = vand.u32 2147483648, %v239_v45  ;;  %v266_v61 = vand.u32 2147483647, %v239_v45  ;;  %vm262_vm4 = vweird.f32 %v239_v45 }
  0xba   :  { %475 = vpow2.f32 %v424_v44  ;;  %v254_v0 = vor.u32 1.1754944e-38, %v253_v56  ;;  %vm252_vm5 = vcmp.eq.f32.partialorder %v251_v55, 8.507059e+37 }
  0xbb   :  { %v269_v4 = vor.u32 1.1754944e-38, %v268_v59  ;;  %vm267_vm7 = vcmp.eq.f32.partialorder %v266_v61, 8.507059e+37 }
  0xbd   :  { %v470_v46 = vpop.eup %469  ;;  %v200_v29 = vpop.f32.mrf.mxu2 }
  0xbe   :  { %v472_v47 = vpop.eup %471  ;;  %v240_v48 = vadd.f32 1.0, %v470_v46  ;;  %v223_v35 = vpop.f32.mrf.mxu3 }
  0xbf   :  { %v474_v49 = vpop.eup %473  ;;  %v243_v50 = vmul.f32 %v472_v47, %v238_v43  ;;  %vm248_vm0 = vweird.f32 %v472_v47 }
  0xc0   :  { %v476_v51 = vpop.eup %475  ;;  %v258_v52 = vmul.f32 %v474_v49, %v239_v45  ;;  %477 = vrcp.f32 %v240_v48  ;;  %vm263_vm1 = vweird.f32 %v474_v49  ;;  %vm249_vm3 = vmor %vm247_vm2, %vm248_vm0  ;;  %v283_v14 = vand.u32 2147483648, %v240_v48 }
  0xc1   :  { %v244_v53 = vsub.f32 1.0, %v243_v50  ;;  %v241_v54 = vadd.f32 1.0, %v476_v51  ;;  %vm264_vm6 = vmor %vm262_vm4, %vm263_vm1  ;;  %v281_v17 = vand.u32 2147483647, %v240_v48  ;;  %vm277_vm9 = vweird.f32 %v240_v48 }
  0xc2   :  { %v259_v57 = vsub.f32 1.0, %v258_v52  ;;  %v284_v23 = vor.u32 1.1754944e-38, %v283_v14 }
  0xc3   :  { %v245_v58 = vmul.f32 %v472_v47, %v244_v53  ;;  %479 = vrcp.f32 %v241_v54  ;;  %v298_v22 = vand.u32 2147483648, %v241_v54  ;;  %v296_v25 = vand.u32 2147483647, %v241_v54 }
  0xc4   :  { %v260_v60 = vmul.f32 %v474_v49, %v259_v57  ;;  %vm282_vm12 = vcmp.eq.f32.partialorder %v281_v17, 8.507059e+37  ;;  %vm292_vm13 = vweird.f32 %v241_v54 }
  0xc5   :  { %v246_v62 = vadd.f32 %v472_v47, %v245_v58  ;;  %vm297_vm15 = vcmp.eq.f32.partialorder %v296_v25, 8.507059e+37 }
  0xc6   :  { %v478_v63 = vpop.eup %477  ;;  %v261_v1 = vadd.f32 %v474_v49, %v260_v60 }
  0xc7   :  { %v250_v3 = vsel %vm249_vm3, %v472_v47, %v246_v62  ;;  %v273_v5 = vmul.f32 %v478_v63, %v240_v48  ;;  %vm278_vm8 = vweird.f32 %v478_v63 }
  0xc8   :  { %v255_v6 = vsel %vm252_vm5, %v254_v0, %v250_v3  ;;  %v265_v7 = vsel %vm264_vm6, %v474_v49, %v261_v1  ;;  %vm279_vm10 = vmor %vm277_vm9, %vm278_vm8 }
  0xc9   :  { %v480_v8 = vpop.eup %479  ;;  %v302_v9 = vmul.f32 %v255_v6, %v626_v30  ;;  %v270_v10 = vsel %vm267_vm7, %v269_v4, %v265_v7  ;;  %v274_v11 = vsub.f32 1.0, %v273_v5 }
  0xca   :  { %v303_v13 = vmul.f32 %v270_v10, %v628_v31  ;;  %v288_v15 = vmul.f32 %v480_v8, %v241_v54  ;;  %vm293_vm11 = vweird.f32 %v480_v8  ;;  %v299_v31 = vor.u32 1.1754944e-38, %v298_v22 }
  0xcb   :  { %v275_v16 = vmul.f32 %v478_v63, %v274_v11  ;;  %v306_v18 = vmul.f32 %v302_v9, %v197_v2  ;;  %vm294_vm14 = vmor %vm292_vm13, %vm293_vm11 }
  0xcc   :  { %v289_v19 = vsub.f32 1.0, %v288_v15  ;;  %v307_v20 = vmul.f32 %v303_v13, %v220_v12 }
  0xcd   :  { %v276_v21 = vadd.f32 %v478_v63, %v275_v16  ;;  %360 = vmatmul.f32.vlgmr.msrb.gmra.mxu0 %v306_v18 }
  0xce   :  { %v290_v24 = vmul.f32 %v480_v8, %v289_v19  ;;  %383 = vmatmul.f32.vlgmr.msrb.gmra.mxu1 %v307_v20 }
  0xcf   :  { %v280_v26 = vsel %vm279_vm10, %v478_v63, %v276_v21 }
  0xd0   :  { %v285_v27 = vsel %vm282_vm12, %v284_v23, %v280_v26  ;;  %v291_v28 = vadd.f32 %v480_v8, %v290_v24 }
  0xd1   :  { %v304_v30 = vmul.f32 %v285_v27, %v632_v38 }
  0xd2   :  { %v295_v32 = vsel %vm294_vm14, %v480_v8, %v291_v28 }
  0xd3   :  { %v300_v33 = vsel %vm297_vm15, %v299_v31, %v295_v32  ;;  %v308_v34 = vmul.f32 %v304_v30, %v200_v29 }
  0xd4   :  { %v305_v36 = vmul.f32 %v300_v33, %v634_v39 }
  0xd5   :  { %363 = vmatmul.f32.vlgmr.msrb.gmra.mxu2 %v308_v34 }
  0xd6   :  { %v309_v37 = vmul.f32 %v305_v36, %v223_v35 }
  0xd8   :  { %386 = vmatmul.f32.vlgmr.msrb.gmra.mxu3 %v309_v37 }
 0x14a   :  { %v361_v40 = vpop.f32.mrf.mxu0 }
 0x14b   :  { %v384_v41 = vpop.f32.mrf.mxu1 }
 0x14c   :  { %v385_v42 = vadd.f32 %v384_v41, %v361_v40 }
 0x14e   :  { %399 = vst [vmem:[#allocation9] sm:$0xff] %v385_v42 }
 0x158   :  { %v364_v43 = vpop.f32.mrf.mxu2 }
 0x15b   :  { %v387_v38 = vpop.f32.mrf.mxu3 }
 0x15c   :  { %v388_v44 = vadd.f32 %v387_v38, %v364_v43 }
 0x15e   :  { %400 = vst [vmem:[#allocation9 + $0x8] sm:$0xff] %v388_v44 }
 0x15f   :  { %413 = dma.vmem_to_hbm [thread:$0]  %s406_s29, 256, %s408_s5, [#allocation5], %s587_s24, %s587_s24, %s588_s25  }
 0x160   :  { %581 = dma.done.wait [#allocation5], 256  }
 0x161   :  { %582 = vsyncadd [#allocation5], 4294967040 }
 0x162   :  { %418 = vsyncpa [#allocation4], 1 }
 0x163   :  { %419 = vsyncpa [#allocation7], 1 }
 0x164   :  { %420 = vsyncpa [#allocation5], 1 }

</bundles_post_ra>
